<compile_context>
chip_gen: v7x
topology: tpu7x:2x2x1
jax: 0.10.0
libtpu: 0.0.40
codegen_flags: <defaults>
</compile_context>

<pallas_src>
import math

import jax
import jax.numpy as jnp
from jax.experimental import pallas as pl
from jax.experimental.pallas import tpu as pltpu

# ----------------------------- problem sizes -----------------------------
STATE_DIM = 16
ACTION_DIM = 4
HIDDEN = 32
BATCH = 2
ACTION_STD_INIT = 0.6

LANE = 128
SUB = 8

assert 2 * HIDDEN <= LANE, "fused block-diagonal packing needs 2*hidden <= 128"
assert STATE_DIM <= LANE and ACTION_DIM + 2 <= 64

_LOG_2PI = math.log(2.0 * math.pi)

# Packed-parameter buffer layout (rows of a [W_ROWS, 128] f32 array):
#   [  0:128)  W1 fused : actor W1 in [0:16, 0:32],  critic W1 in [0:16, 64:96]
#   [128:256)  W2 fused : actor W2 in [  0:32, 0:32], critic W2 in [64:96, 64:96] (block-diag)
#   [256:384)  W3 fused : same block-diag layout as W2
#   [384:512)  W4 fused : actor W4 in [0:32, 0:4],    critic W4 in [64:96, 4:5]
#   row 512    b1 fused   (actor lanes 0..31, critic lanes 64..95)
#   row 513    b2 fused
#   row 514    b3 fused
#   row 515    b4 fused   (actor lanes 0..3, critic lane 4)
#   row 516    logp additive constant  = sum(log var) + k*log(2*pi), replicated on all lanes
#   row 517    1/var in lanes 0..3, zeros elsewhere (padding lanes contribute 0 to quad form)
#   rows 518/519 zero padding (sublane multiple of 8)
W_ROWS = 520
_CRIT = 64  # lane offset of the critic block


def _rup(x, m):
    return ((x + m - 1) // m) * m


# ----------------------------- Pallas kernel -----------------------------
def actor_critic_fused_kernel(state_ref, action_ref, w_ref, out_ref):
    x = state_ref[...]                                   # [TB, 128]

    w1 = w_ref[0:128, :]
    w2 = w_ref[128:256, :]
    w3 = w_ref[256:384, :]
    w4 = w_ref[384:512, :]
    b1 = w_ref[512:513, :]
    b2 = w_ref[513:514, :]
    b3 = w_ref[514:515, :]
    b4 = w_ref[515:516, :]
    const_row = w_ref[516:517, :]                        # [1,128], every lane == logp const
    inv_var = w_ref[517:518, :]                          # [1,128], lanes 0..3 == 1/var, else 0

    # fused actor+critic MLP (block-diagonal weights keep the two nets independent)
    h = jnp.tanh(jnp.dot(x, w1, preferred_element_type=jnp.float32) + b1)
    h = jnp.tanh(jnp.dot(h, w2, preferred_element_type=jnp.float32) + b2)
    h = jnp.tanh(jnp.dot(h, w3, preferred_element_type=jnp.float32) + b3)
    z = jnp.dot(h, w4, preferred_element_type=jnp.float32) + b4     # [TB, 128]

    lane = jax.lax.broadcasted_iota(jnp.int32, z.shape, 1)
    # lanes 0..3: tanh -> action_mean; lane 4: raw linear -> state_value; rest: 0
    mv = jnp.where(lane < ACTION_DIM, jnp.tanh(z), z)

    # diagonal-covariance Gaussian log_prob(action); padded lanes have inv_var == 0
    diff = action_ref[...] - mv
    quad = jnp.sum(diff * diff * inv_var, axis=-1, keepdims=True)   # [TB, 1]
    logp_full = -0.5 * (quad + const_row)                           # [TB, 128]

    # lane-dense output: 0..3 mean | 4 value | 5 logp | 6..127 zeros
    out_ref[...] = jnp.where(lane == ACTION_DIM + 1, logp_full, mv)


# ----------------------------- params / packing -----------------------------
def _orthogonal(key, shape):
    """torch.nn.init.orthogonal_ analogue for a (out, in) weight."""
    rows, cols = shape
    n = max(rows, cols)
    a = jax.random.normal(key, (n, n), dtype=jnp.float32)
    q, r = jnp.linalg.qr(a)
    d = jnp.diag(r)
    q = q * jnp.where(d >= 0, 1.0, -1.0)
    return q[:rows, :cols]


def make_params(key):
    """Deterministic parameter init (orthogonal weights, small linspace biases)."""
    keys = jax.random.split(key, 8)
    actor_dims = [(STATE_DIM, HIDDEN), (HIDDEN, HIDDEN), (HIDDEN, HIDDEN), (HIDDEN, ACTION_DIM)]
    critic_dims = [(STATE_DIM, HIDDEN), (HIDDEN, HIDDEN), (HIDDEN, HIDDEN), (HIDDEN, 1)]
    params = {}
    for i, (din, dout) in enumerate(actor_dims):
        w = _orthogonal(keys[i], (dout, din)).T              # stored as (in, out) == W.T
        params[f"aw{i+1}"] = w
        params[f"ab{i+1}"] = jnp.linspace(-0.05, 0.05, dout, dtype=jnp.float32)
    for i, (din, dout) in enumerate(critic_dims):
        w = _orthogonal(keys[4 + i], (dout, din)).T
        params[f"cw{i+1}"] = w
        params[f"cb{i+1}"] = jnp.linspace(-0.05, 0.05, dout, dtype=jnp.float32)
    return params


def pack_params(params, action_var):
    """One-time packing of all weights/biases + log-prob constants into one buffer."""
    W = jnp.zeros((W_ROWS, LANE), jnp.float32)
    # layer 1
    W = W.at[0:STATE_DIM, 0:HIDDEN].set(params["aw1"])
    W = W.at[0:STATE_DIM, _CRIT:_CRIT + HIDDEN].set(params["cw1"])
    # layer 2 (block-diagonal)
    W = W.at[128:128 + HIDDEN, 0:HIDDEN].set(params["aw2"])
    W = W.at[128 + _CRIT:128 + _CRIT + HIDDEN, _CRIT:_CRIT + HIDDEN].set(params["cw2"])
    # layer 3 (block-diagonal)
    W = W.at[256:256 + HIDDEN, 0:HIDDEN].set(params["aw3"])
    W = W.at[256 + _CRIT:256 + _CRIT + HIDDEN, _CRIT:_CRIT + HIDDEN].set(params["cw3"])
    # layer 4 (actor -> lanes 0..3, critic -> lane 4)
    W = W.at[384:384 + HIDDEN, 0:ACTION_DIM].set(params["aw4"])
    W = W.at[384 + _CRIT:384 + _CRIT + HIDDEN, ACTION_DIM:ACTION_DIM + 1].set(params["cw4"])
    # biases
    W = W.at[512, 0:HIDDEN].set(params["ab1"])
    W = W.at[512, _CRIT:_CRIT + HIDDEN].set(params["cb1"])
    W = W.at[513, 0:HIDDEN].set(params["ab2"])
    W = W.at[513, _CRIT:_CRIT + HIDDEN].set(params["cb2"])
    W = W.at[514, 0:HIDDEN].set(params["ab3"])
    W = W.at[514, _CRIT:_CRIT + HIDDEN].set(params["cb3"])
    W = W.at[515, 0:ACTION_DIM].set(params["ab4"])
    W = W.at[515, ACTION_DIM].set(params["cb4"][0])
    # log-prob constant (replicated on all lanes) and exact 1/var
    const = jnp.sum(jnp.log(action_var)) + ACTION_DIM * _LOG_2PI
    W = W.at[516, :].set(const)
    W = W.at[517, 0:ACTION_DIM].set(1.0 / action_var)
    return W


# ----------------------------- evaluate wrapper -----------------------------
@jax.jit
def evaluate_pallas(state, action, packed_w, action_var):
    """ActorCritic.evaluate: returns (action_logprobs, state_values, dist_entropy, action_mean)."""
    B = state.shape[0]
    TB = min(512, _rup(B, SUB))        # batch tile (mult. of 8); small & v7x-VMEM safe
    B_PAD = _rup(B, TB)

    state_p = jnp.zeros((B_PAD, LANE), jnp.float32).at[:B, :STATE_DIM].set(
        state.astype(jnp.float32))
    action_p = jnp.zeros((B_PAD, LANE), jnp.float32).at[:B, :ACTION_DIM].set(
        action.astype(jnp.float32))

    out = pl.pallas_call(
        actor_critic_fused_kernel,
        out_shape=jax.ShapeDtypeStruct((B_PAD, LANE), jnp.float32),
        grid_spec=pltpu.PrefetchScalarGridSpec(
            num_scalar_prefetch=0,
            grid=(B_PAD // TB,),
            in_specs=[
                pl.BlockSpec((TB, LANE), lambda i: (i, 0)),        # state tile
                pl.BlockSpec((TB, LANE), lambda i: (i, 0)),        # action tile
                pl.BlockSpec((W_ROWS, LANE), lambda i: (0, 0)),    # packed params, VMEM-resident
            ],
            out_specs=pl.BlockSpec((TB, LANE), lambda i: (i, 0)),
        ),
        compiler_params=pltpu.CompilerParams(
            dimension_semantics=("parallel",)),                    # 2nd TC on v7x for big batches
    )(state_p, action_p, packed_w)

    action_mean = out[:B, :ACTION_DIM]
    state_values = out[:B, ACTION_DIM:ACTION_DIM + 1]
    action_logprobs = out[:B, ACTION_DIM + 1]
    # entropy of a diagonal Gaussian — constant over the batch
    entropy = 0.5 * ACTION_DIM * (1.0 + _LOG_2PI) + 0.5 * jnp.sum(jnp.log(action_var))
    dist_entropy = jnp.full((B,), entropy, dtype=jnp.float32)
    return action_logprobs, state_values, dist_entropy, action_mean


# ----------------------------- pure-JAX reference -----------------------------
def evaluate_ref(state, action, params, action_var):
    def lin(x, w, b):
        return x @ w + b
    h = jnp.tanh(lin(state, params["aw1"], params["ab1"]))
    h = jnp.tanh(lin(h, params["aw2"], params["ab2"]))
    h = jnp.tanh(lin(h, params["aw3"], params["ab3"]))
    mean = jnp.tanh(lin(h, params["aw4"], params["ab4"]))
    c = jnp.tanh(lin(state, params["cw1"], params["cb1"]))
    c = jnp.tanh(lin(c, params["cw2"], params["cb2"]))
    c = jnp.tanh(lin(c, params["cw3"], params["cb3"]))
    value = lin(c, params["cw4"], params["cb4"])
    diff = action - mean
    logp = -0.5 * (jnp.sum(diff * diff / action_var, axis=-1)
                   + jnp.sum(jnp.log(action_var))
                   + ACTION_DIM * _LOG_2PI)
    return logp, value, mean


# ----------------------------- main -----------------------------
if __name__ == "__main__":
    key = jax.random.PRNGKey(0)
    k_param, k_state, k_action = jax.random.split(key, 3)

    params = make_params(k_param)
    action_var = jnp.full((ACTION_DIM,), ACTION_STD_INIT * ACTION_STD_INIT, dtype=jnp.float32)

    # one-time packing (re-pack only if set_action_std() changes action_var)
    packed_w = jax.block_until_ready(pack_params(params, action_var))

    state = jax.random.normal(k_state, (BATCH, STATE_DIM), dtype=jnp.float32)
    action = jax.random.normal(k_action, (BATCH, ACTION_DIM), dtype=jnp.float32)

    logp, values, entropy, mean = evaluate_pallas(state, action, packed_w, action_var)
    jax.block_until_ready((logp, values, entropy, mean))

    # correctness check vs. pure-JAX reference
    logp_ref, values_ref, mean_ref = evaluate_ref(state, action, params, action_var)
    assert jnp.allclose(mean, mean_ref, atol=1e-4), "action_mean mismatch"
    assert jnp.allclose(values, values_ref, atol=1e-4), "state_value mismatch"
    assert jnp.allclose(logp, logp_ref, atol=1e-4), "log_prob mismatch"

    print("KERNEL_OK")
</pallas_src>

<mosaic_0001>
module attributes {stable_mosaic.version = 11 : i64} {
  func.func @actor_critic_fused_kernel(%arg0: i32, %arg1: memref<8x128xf32, #tpu.memory_space<vmem>>, %arg2: memref<8x128xf32, #tpu.memory_space<vmem>>, %arg3: memref<520x128xf32, #tpu.memory_space<vmem>>, %arg4: memref<8x128xf32, #tpu.memory_space<vmem>>) attributes {dimension_semantics = [#tpu.dimension_semantics<parallel>], iteration_bounds = array<i64: 1>, scalar_prefetch = 0 : i64, scratch_operands = 0 : i64, tpu.core_type = #tpu.core_type<tc>, window_params = [{transform_indices = @transform_0, window_bounds = array<i64: 8, 128>}, {transform_indices = @transform_1, window_bounds = array<i64: 8, 128>}, {pipeline_mode = #tpu.pipeline_mode<synchronous>, transform_indices = @transform_2, window_bounds = array<i64: 520, 128>}, {transform_indices = @transform_3, window_bounds = array<i64: 8, 128>}]} {
    %c0 = arith.constant 0 : index
    %c0_0 = arith.constant 0 : index
    %0 = vector.load %arg1[%c0, %c0_0] : memref<8x128xf32, #tpu.memory_space<vmem>>, vector<8x128xf32>
    %c0_1 = arith.constant 0 : index
    %c0_2 = arith.constant 0 : index
    %1 = vector.load %arg3[%c0_1, %c0_2] : memref<520x128xf32, #tpu.memory_space<vmem>>, vector<128x128xf32>
    %c128 = arith.constant 128 : index
    %c0_3 = arith.constant 0 : index
    %2 = vector.load %arg3[%c128, %c0_3] : memref<520x128xf32, #tpu.memory_space<vmem>>, vector<128x128xf32>
    %c256 = arith.constant 256 : index
    %c0_4 = arith.constant 0 : index
    %3 = vector.load %arg3[%c256, %c0_4] : memref<520x128xf32, #tpu.memory_space<vmem>>, vector<128x128xf32>
    %c384 = arith.constant 384 : index
    %c0_5 = arith.constant 0 : index
    %4 = vector.load %arg3[%c384, %c0_5] : memref<520x128xf32, #tpu.memory_space<vmem>>, vector<128x128xf32>
    %c512 = arith.constant 512 : index
    %c0_6 = arith.constant 0 : index
    %5 = vector.load %arg3[%c512, %c0_6] : memref<520x128xf32, #tpu.memory_space<vmem>>, vector<1x128xf32>
    %c513 = arith.constant 513 : index
    %c0_7 = arith.constant 0 : index
    %6 = vector.load %arg3[%c513, %c0_7] : memref<520x128xf32, #tpu.memory_space<vmem>>, vector<1x128xf32>
    %c514 = arith.constant 514 : index
    %c0_8 = arith.constant 0 : index
    %7 = vector.load %arg3[%c514, %c0_8] : memref<520x128xf32, #tpu.memory_space<vmem>>, vector<1x128xf32>
    %c515 = arith.constant 515 : index
    %c0_9 = arith.constant 0 : index
    %8 = vector.load %arg3[%c515, %c0_9] : memref<520x128xf32, #tpu.memory_space<vmem>>, vector<1x128xf32>
    %c516 = arith.constant 516 : index
    %c0_10 = arith.constant 0 : index
    %9 = vector.load %arg3[%c516, %c0_10] : memref<520x128xf32, #tpu.memory_space<vmem>>, vector<1x128xf32>
    %c517 = arith.constant 517 : index
    %c0_11 = arith.constant 0 : index
    %10 = vector.load %arg3[%c517, %c0_11] : memref<520x128xf32, #tpu.memory_space<vmem>>, vector<1x128xf32>
    %cst = arith.constant dense<0.000000e+00> : vector<8x128xf32>
    %11 = tpu.matmul %0, %1, %cst {dimension_numbers = #tpu.dot_dimension_numbers<[1], [0], [0], [1], [0, 0, 1, 1], [], []>} : vector<8x128xf32>, vector<128x128xf32>, vector<8x128xf32> -> vector<8x128xf32>
    %12 = vector.broadcast %5 : vector<1x128xf32> to vector<8x128xf32>
    %13 = arith.addf %11, %12 : vector<8x128xf32>
    %14 = math.tanh %13 : vector<8x128xf32>
    %cst_12 = arith.constant dense<0.000000e+00> : vector<8x128xf32>
    %15 = tpu.matmul %14, %2, %cst_12 {dimension_numbers = #tpu.dot_dimension_numbers<[1], [0], [0], [1], [0, 0, 1, 1], [], []>} : vector<8x128xf32>, vector<128x128xf32>, vector<8x128xf32> -> vector<8x128xf32>
    %16 = vector.broadcast %6 : vector<1x128xf32> to vector<8x128xf32>
    %17 = arith.addf %15, %16 : vector<8x128xf32>
    %18 = math.tanh %17 : vector<8x128xf32>
    %cst_13 = arith.constant dense<0.000000e+00> : vector<8x128xf32>
    %19 = tpu.matmul %18, %3, %cst_13 {dimension_numbers = #tpu.dot_dimension_numbers<[1], [0], [0], [1], [0, 0, 1, 1], [], []>} : vector<8x128xf32>, vector<128x128xf32>, vector<8x128xf32> -> vector<8x128xf32>
    %20 = vector.broadcast %7 : vector<1x128xf32> to vector<8x128xf32>
    %21 = arith.addf %19, %20 : vector<8x128xf32>
    %22 = math.tanh %21 : vector<8x128xf32>
    %cst_14 = arith.constant dense<0.000000e+00> : vector<8x128xf32>
    %23 = tpu.matmul %22, %4, %cst_14 {dimension_numbers = #tpu.dot_dimension_numbers<[1], [0], [0], [1], [0, 0, 1, 1], [], []>} : vector<8x128xf32>, vector<128x128xf32>, vector<8x128xf32> -> vector<8x128xf32>
    %24 = vector.broadcast %8 : vector<1x128xf32> to vector<8x128xf32>
    %25 = arith.addf %23, %24 : vector<8x128xf32>
    %26 = tpu.iota {dimensions = array<i32: 1>} : vector<8x128xi32>
    %c4_i32 = arith.constant 4 : i32
    %27 = vector.broadcast %c4_i32 : i32 to vector<8x128xi32>
    %28 = arith.cmpi slt, %26, %27 : vector<8x128xi32>
    %29 = math.tanh %25 : vector<8x128xf32>
    %30 = arith.select %28, %29, %25 : vector<8x128xi1>, vector<8x128xf32>
    %c0_15 = arith.constant 0 : index
    %c0_16 = arith.constant 0 : index
    %31 = vector.load %arg2[%c0_15, %c0_16] : memref<8x128xf32, #tpu.memory_space<vmem>>, vector<8x128xf32>
    %32 = arith.subf %31, %30 : vector<8x128xf32>
    %33 = arith.mulf %32, %32 : vector<8x128xf32>
    %34 = vector.broadcast %10 : vector<1x128xf32> to vector<8x128xf32>
    %35 = arith.mulf %33, %34 : vector<8x128xf32>
    %cst_17 = arith.constant dense<0.000000e+00> : vector<8xf32>
    %36 = vector.multi_reduction <add>, %35, %cst_17 [1] : vector<8x128xf32> to vector<8xf32>
    %37 = vector.shape_cast %36 : vector<8xf32> to vector<8x1xf32>
    %38 = vector.broadcast %37 : vector<8x1xf32> to vector<8x128xf32>
    %39 = vector.broadcast %9 : vector<1x128xf32> to vector<8x128xf32>
    %40 = arith.addf %38, %39 : vector<8x128xf32>
    %cst_18 = arith.constant -5.000000e-01 : f32
    %41 = vector.broadcast %cst_18 : f32 to vector<8x128xf32>
    %42 = arith.mulf %41, %40 : vector<8x128xf32>
    %c5_i32 = arith.constant 5 : i32
    %43 = vector.broadcast %c5_i32 : i32 to vector<8x128xi32>
    %44 = arith.cmpi eq, %26, %43 : vector<8x128xi32>
    %45 = arith.select %44, %42, %30 : vector<8x128xi1>, vector<8x128xf32>
    %c0_19 = arith.constant 0 : index
    %c0_20 = arith.constant 0 : index
    %46 = vector.load %arg4[%c0_19, %c0_20] : memref<8x128xf32, #tpu.memory_space<vmem>>, vector<8x128xf32>
    tpu.vector_store %arg4[%c0_19, %c0_20], %45 {strides = array<i32>} : memref<8x128xf32, #tpu.memory_space<vmem>>, vector<8x128xf32>,
    return
  }
  func.func @transform_0(%arg0: i32) -> (i32, i32) {
    %c0_i32 = arith.constant 0 : i32
    %c0_i32_0 = arith.constant 0 : i32
    return %arg0, %c0_i32 : i32, i32
  }
  func.func @transform_1(%arg0: i32) -> (i32, i32) {
    %c0_i32 = arith.constant 0 : i32
    %c0_i32_0 = arith.constant 0 : i32
    return %arg0, %c0_i32 : i32, i32
  }
  func.func @transform_2(%arg0: i32) -> (i32, i32) {
    %c0_i32 = arith.constant 0 : i32
    %c0_i32_0 = arith.constant 0 : i32
    %c0_i32_1 = arith.constant 0 : i32
    return %c0_i32, %c0_i32_0 : i32, i32
  }
  func.func @transform_3(%arg0: i32) -> (i32, i32) {
    %c0_i32 = arith.constant 0 : i32
    %c0_i32_0 = arith.constant 0 : i32
    return %arg0, %c0_i32 : i32, i32
  }
}

</mosaic_0001>

<bundles_post_ra>
// kernel: evaluate_pallas.1
= control target key start
LH: loop header
LB: loop body
LE: loop exit
PB: predicated region body
PF: predicated region fallthrough
CT: control target
= control target key end

     0   :  { %8 = vsyncpa [#allocation3], 0  ;;  %s775_s12 = smov [#allocation2]   ;;  %s862_s0 = inlined_call_operand.vmem [shape: f32[8,128], index: 0, kind: input, shape index: {}]   ;;  %s863_s1 = inlined_call_operand.vmem [shape: f32[8,128], index: 1, kind: input, shape index: {}]   ;;  %s864_s2 = inlined_call_operand.hbm [shape: f32[520,128], index: 2, kind: input, shape index: {}]   ;;  %s865_s3 = inlined_call_operand.vmem [shape: f32[8,128], index: 3, kind: output, shape index: {}]  }
   0x1   :  { %s18_s13 = sshll.u32 %s775_s12, 4  ;;  %s751_s16 = scalar_lea.hbm %s864_s2, 8320  ;;  %s19_s13 = int_to_ptr.vmem [resolvable:$true] %s18_s13 }
   0x2   :  { %p752_p0 = scmp.ne.s32.totalorder %s864_s2, %s751_s16  ;;  %p755_p1 = scmp.lt.u32.totalorder %s751_s16, %s864_s2 }
   0x4   :  { %p757_p2 = pnand %p755_p1, %p752_p0 }
   0x6   :  { %760 = shalt.err (!%p757_p2)
}
   0x7   :  { %s761_s21 = scalar_lea.vmem %s19_s13, 8320  ;;  %p766_p4 = scmp.lt.s32.totalorder %s19_s13, %s19_s13 }
   0x8   :  { %p762_p3 = scmp.ne.s32.totalorder %s19_s13, %s761_s21  ;;  %p767_p5 = scmp.lt.s32.totalorder %s761_s21, %s761_s21 }
   0xa   :  { %p768_p6 = por %p767_p5, %p766_p4 }
   0xc   :  { %p769_p7 = pnand %p768_p6, %p762_p3 }
   0xe   :  { %772 = shalt.err (!%p769_p7)
}
   0xf   :  { %s776_s22 = smov 128   ;;  %s777_s23 = smov 8  }
  0x10   :  { %24 = dma.hbm_to_vmem [thread:$0]  %s864_s2, 8320, %s19_s13, [#allocation3], %s776_s22, %s776_s22, %s777_s23  }
  0x11   :  { %773 = dma.done.wait [#allocation3], 8320  }
  0x12   :  { %774 = vsyncadd [#allocation3], 4294958976  ;;  %v778_v0 = vmov 0.0|0.0   ;;  %vm779_vm0 = vmmov 0   ;;  %v780_v1 = vmov 0.0   ;;  %v29_v2 = vld [vmem:[#allocation2] sm:$0xff] }
  0x13   :  { %641 = vmatprep.subr.bf16.mxu0 %v778_v0  ;;  %533 = vmatprep.mubr.msk.f32.mxu0 %vm779_vm0, %v780_v1  ;;  %v30_v3 = vld [vmem:[#allocation2 + $0x8] sm:$0xff]  ;;  %v31_v4 = vld [vmem:[#allocation2 + $0x10] sm:$0xff]  ;;  %v32_v6 = vld [vmem:[#allocation2 + $0x18] sm:$0xff] }
  0x14   :  { %665 = vmatprep.subr.bf16.mxu1 %v778_v0  ;;  %568 = vmatprep.mubr.msk.f32.mxu1 %vm779_vm0, %v780_v1  ;;  %v642_v5 = vpack.c.bf16 %v30_v3, %v29_v2  ;;  %v645_v7 = vpack.c.bf16 %v32_v6, %v31_v4  ;;  %v33_v8 = vld [vmem:[#allocation2 + $0x20] sm:$0xff]  ;;  %v34_v9 = vld [vmem:[#allocation2 + $0x28] sm:$0xff]  ;;  %v47_v12 = vld [vmem:[#allocation2 + $0x90] sm:$0xff] }
  0x15   :  { %v45_v10 = vld [vmem:[#allocation2 + $0x80] sm:$0xff]  ;;  %v46_v11 = vld [vmem:[#allocation2 + $0x88] sm:$0xff]  ;;  %v48_v13 = vld [vmem:[#allocation2 + $0x98] sm:$0xff]  ;;  %v648_v14 = vpack.c.bf16 %v34_v9, %v33_v8 }
  0x16   :  { %643 = vmatpush3.bf16.msra.mxu0 %v642_v5  ;;  %v666_v15 = vpack.c.bf16 %v46_v11, %v45_v10  ;;  %v35_v16 = vld [vmem:[#allocation2 + $0x30] sm:$0xff]  ;;  %v36_v17 = vld [vmem:[#allocation2 + $0x38] sm:$0xff]  ;;  %v669_v18 = vpack.c.bf16 %v48_v13, %v47_v12  ;;  %v49_v19 = vld [vmem:[#allocation2 + $0xa0] sm:$0xff] }
  0x17   :  { %644 = vmatprep.subr.bf16.mxu0 %v778_v0  ;;  %v50_v20 = vld [vmem:[#allocation2 + $0xa8] sm:$0xff]  ;;  %v651_v21 = vpack.c.bf16 %v36_v17, %v35_v16  ;;  %v37_v22 = vld [vmem:[#allocation2 + $0x40] sm:$0xff]  ;;  %v51_v25 = vld [vmem:[#allocation2 + $0xb0] sm:$0xff] }
  0x18   :  { %667 = vmatpush3.bf16.msra.mxu1 %v666_v15  ;;  %v38_v23 = vld [vmem:[#allocation2 + $0x48] sm:$0xff]  ;;  %v672_v24 = vpack.c.bf16 %v50_v20, %v49_v19  ;;  %v52_v26 = vld [vmem:[#allocation2 + $0xb8] sm:$0xff]  ;;  %v39_v28 = vld [vmem:[#allocation2 + $0x50] sm:$0xff] }
  0x19   :  { %668 = vmatprep.subr.bf16.mxu1 %v778_v0  ;;  %v654_v27 = vpack.c.bf16 %v38_v23, %v37_v22  ;;  %v40_v29 = vld [vmem:[#allocation2 + $0x58] sm:$0xff]  ;;  %v675_v30 = vpack.c.bf16 %v52_v26, %v51_v25  ;;  %v53_v31 = vld [vmem:[#allocation2 + $0xc0] sm:$0xff]  ;;  %v54_v32 = vld [vmem:[#allocation2 + $0xc8] sm:$0xff] }
  0x1a   :  { %646 = vmatpush3.bf16.msra.mxu0 %v645_v7  ;;  %v657_v33 = vpack.c.bf16 %v40_v29, %v39_v28  ;;  %v41_v34 = vld [vmem:[#allocation2 + $0x60] sm:$0xff]  ;;  %v42_v35 = vld [vmem:[#allocation2 + $0x68] sm:$0xff]  ;;  %v678_v36 = vpack.c.bf16 %v54_v32, %v53_v31  ;;  %v43_v38 = vld [vmem:[#allocation2 + $0x70] sm:$0xff] }
  0x1b   :  { %647 = vmatprep.subr.bf16.mxu0 %v778_v0  ;;  %v660_v37 = vpack.c.bf16 %v42_v35, %v41_v34  ;;  %v44_v39 = vld [vmem:[#allocation2 + $0x78] sm:$0xff]  ;;  %v28_v41 = vld [vmem:[%s862_s0] sm:$0xff]  ;;  %v55_v42 = vld [vmem:[#allocation2 + $0xd0] sm:$0xff] }
  0x1c   :  { %670 = vmatpush3.bf16.msra.mxu1 %v669_v18  ;;  %v663_v40 = vpack.c.bf16 %v44_v39, %v43_v38  ;;  %v56_v43 = vld [vmem:[#allocation2 + $0xd8] sm:$0xff]  ;;  %v57_v45 = vld [vmem:[#allocation2 + $0xe0] sm:$0xff]  ;;  %v58_v46 = vld [vmem:[#allocation2 + $0xe8] sm:$0xff] }
  0x1d   :  { %671 = vmatprep.subr.bf16.mxu1 %v778_v0  ;;  %v681_v44 = vpack.c.bf16 %v56_v43, %v55_v42  ;;  %v684_v47 = vpack.c.bf16 %v58_v46, %v57_v45  ;;  %v59_v48 = vld [vmem:[#allocation2 + $0xf0] sm:$0xff]  ;;  %v60_v49 = vld [vmem:[#allocation2 + $0xf8] sm:$0xff]  ;;  %v61_v51 = vld [vmem:[#allocation2 + $0x100] sm:$0xff] }
  0x1e   :  { %649 = vmatpush3.bf16.msra.mxu0 %v648_v14  ;;  %v687_v50 = vpack.c.bf16 %v60_v49, %v59_v48  ;;  %v62_v52 = vld [vmem:[#allocation2 + $0x108] sm:$0xff]  ;;  %v63_v53 = vld [vmem:[#allocation2 + $0x110] sm:$0xff]  ;;  %v64_v55 = vld [vmem:[#allocation2 + $0x118] sm:$0xff] }
  0x1f   :  { %650 = vmatprep.subr.bf16.mxu0 %v778_v0  ;;  %v690_v54 = vpack.c.bf16 %v62_v52, %v61_v51  ;;  %v693_v56 = vpack.c.bf16 %v64_v55, %v63_v53  ;;  %v65_v57 = vld [vmem:[#allocation2 + $0x120] sm:$0xff]  ;;  %v66_v58 = vld [vmem:[#allocation2 + $0x128] sm:$0xff]  ;;  %v67_v60 = vld [vmem:[#allocation2 + $0x130] sm:$0xff]  ;;  %v398_v55 = vlaneseq }
  0x20   :  { %673 = vmatpush3.bf16.msra.mxu1 %v672_v24  ;;  %v696_v59 = vpack.c.bf16 %v66_v58, %v65_v57  ;;  %v68_v61 = vld [vmem:[#allocation2 + $0x138] sm:$0xff]  ;;  %v69_v63 = vld [vmem:[#allocation2 + $0x140] sm:$0xff]  ;;  %v70_v2 = vld [vmem:[#allocation2 + $0x148] sm:$0xff] }
  0x21   :  { %674 = vmatprep.subr.bf16.mxu1 %v778_v0  ;;  %v699_v62 = vpack.c.bf16 %v68_v61, %v67_v60  ;;  %v702_v3 = vpack.c.bf16 %v70_v2, %v69_v63  ;;  %v427_v4 = vld [vmem:[#allocation2 + $0x200] ss:$0 sm:$0xff]  ;;  %v71_v9 = vld [vmem:[#allocation2 + $0x150] sm:$0xff]  ;;  %v72_v10 = vld [vmem:[#allocation2 + $0x158] sm:$0xff] }
  0x22   :  { %652 = vmatpush3.bf16.msra.mxu0 %v651_v21  ;;  %v705_v11 = vpack.c.bf16 %v72_v10, %v71_v9  ;;  %v73_v12 = vld [vmem:[#allocation2 + $0x160] sm:$0xff]  ;;  %v74_v13 = vld [vmem:[#allocation2 + $0x168] sm:$0xff]  ;;  %v75_v15 = vld [vmem:[#allocation2 + $0x170] sm:$0xff] }
  0x23   :  { %653 = vmatprep.subr.bf16.mxu0 %v778_v0  ;;  %v708_v14 = vpack.c.bf16 %v74_v13, %v73_v12  ;;  %v76_v16 = vld [vmem:[#allocation2 + $0x178] sm:$0xff]  ;;  %v77_v18 = vld [vmem:[#allocation2 + $0x180] sm:$0xff]  ;;  %v78_v19 = vld [vmem:[#allocation2 + $0x188] sm:$0xff] }
  0x24   :  { %676 = vmatpush3.bf16.msra.mxu1 %v675_v30  ;;  %v711_v17 = vpack.c.bf16 %v76_v16, %v75_v15  ;;  %v79_v20 = vld [vmem:[#allocation2 + $0x190] sm:$0xff]  ;;  %v80_v21 = vld [vmem:[#allocation2 + $0x198] sm:$0xff]  ;;  %v81_v23 = vld [vmem:[#allocation2 + $0x1a0] sm:$0xff] }
  0x25   :  { %677 = vmatprep.subr.bf16.mxu1 %v778_v0  ;;  %v717_v22 = vpack.c.bf16 %v80_v21, %v79_v20  ;;  %v82_v24 = vld [vmem:[#allocation2 + $0x1a8] sm:$0xff]  ;;  %v83_v26 = vld [vmem:[#allocation2 + $0x1b0] sm:$0xff]  ;;  %v85_v29 = vld [vmem:[#allocation2 + $0x1c0] sm:$0xff] }
  0x26   :  { %655 = vmatpush3.bf16.msra.mxu0 %v654_v27  ;;  %v720_v25 = vpack.c.bf16 %v82_v24, %v81_v23  ;;  %v84_v27 = vld [vmem:[#allocation2 + $0x1b8] sm:$0xff]  ;;  %v86_v30 = vld [vmem:[#allocation2 + $0x1c8] sm:$0xff]  ;;  %v428_v32 = vld [vmem:[#allocation2 + $0x201] ss:$0 sm:$0xff] }
  0x27   :  { %656 = vmatprep.subr.bf16.mxu0 %v778_v0  ;;  %v723_v28 = vpack.c.bf16 %v84_v27, %v83_v26  ;;  %v726_v31 = vpack.c.bf16 %v86_v30, %v85_v29  ;;  %v88_v38 = vld [vmem:[#allocation2 + $0x1d8] sm:$0xff]  ;;  %v91_v43 = vld [vmem:[#allocation2 + $0x1f0] sm:$0xff]  ;;  %v429_v46 = vld [vmem:[#allocation2 + $0x202] ss:$0 sm:$0xff] }
  0x28   :  { %679 = vmatpush3.bf16.msra.mxu1 %v678_v36  ;;  %v430_v51 = vld [vmem:[#allocation2 + $0x203] ss:$0 sm:$0xff]  ;;  %v431_v60 = vld [vmem:[#allocation2 + $0x205] ss:$0 sm:$0xff]  ;;  %v432_v63 = vld [vmem:[#allocation2 + $0x204] ss:$0 sm:$0xff] }
  0x29   :  { %680 = vmatprep.subr.bf16.mxu1 %v778_v0 }
  0x2a   :  { %658 = vmatpush3.bf16.msra.mxu0 %v657_v33 }
  0x2b   :  { %659 = vmatprep.subr.bf16.mxu0 %v778_v0 }
  0x2c   :  { %682 = vmatpush3.bf16.msra.mxu1 %v681_v44  ;;  %v92_v44 = vld [vmem:[#allocation2 + $0x1f8] sm:$0xff] }
  0x2d   :  { %683 = vmatprep.subr.bf16.mxu1 %v778_v0  ;;  %v735_v45 = vpack.c.bf16 %v92_v44, %v91_v43 }
  0x2e   :  { %661 = vmatpush3.bf16.msra.mxu0 %v660_v37  ;;  %v87_v37 = vld [vmem:[#allocation2 + $0x1d0] sm:$0xff] }
  0x2f   :  { %662 = vmatprep.subr.bf16.mxu0 %v778_v0  ;;  %v729_v39 = vpack.c.bf16 %v88_v38, %v87_v37 }
  0x30   :  { %685 = vmatpush3.bf16.msra.mxu1 %v684_v47 }
  0x31   :  { %686 = vmatprep.subr.bf16.mxu1 %v778_v0 }
  0x32   :  { %664 = vmatpush3.bf16.msra.mxu0 %v663_v40  ;;  %v89_v40 = vld [vmem:[#allocation2 + $0x1e0] sm:$0xff] }
  0x33   :  { %689 = vmatprep.subr.bf16.mxu0 %v778_v0 }
  0x34   :  { %688 = vmatpush3.bf16.msra.mxu1 %v687_v50 }
  0x35   :  { %534 = vmatmul.mubr.f32.vlgmr.msra.gmra.mrb[0].mxu0 %v28_v41  ;;  %713 = vmatprep.subr.bf16.mxu1 %v778_v0  ;;  %v90_v41 = vld [vmem:[#allocation2 + $0x1e8] sm:$0xff] }
  0x36   :  { %603 = vmatprep.mubr.msk.f32.mxu0 %vm779_vm0, %v780_v1  ;;  %691 = vmatpush3.bf16.msra.mxu0 %v690_v54  ;;  %v732_v42 = vpack.c.bf16 %v90_v41, %v89_v40 }
  0x37   :  { %692 = vmatprep.subr.bf16.mxu0 %v778_v0 }
  0x3a   :  { %694 = vmatpush3.bf16.msra.mxu0 %v693_v56  ;;  %v399_v56 = vand.u32 127, %v398_v55 }
  0x3b   :  { %695 = vmatprep.subr.bf16.mxu0 %v778_v0 }
  0x3c   :  { %vm400_vm1 = vcmp.lt.s32.totalorder %v399_v56, 4  ;;  %vm419_vm2 = vcmp.eq.s32.totalorder %v399_v56, 5 }
  0x3e   :  { %697 = vmatpush3.bf16.msra.mxu0 %v696_v59 }
  0x3f   :  { %698 = vmatprep.subr.bf16.mxu0 %v778_v0 }
  0x42   :  { %700 = vmatpush3.bf16.msra.mxu0 %v699_v62 }
  0x43   :  { %701 = vmatprep.subr.bf16.mxu0 %v778_v0 }
  0x46   :  { %703 = vmatpush3.bf16.msra.mxu0 %v702_v3 }
  0x47   :  { %704 = vmatprep.subr.bf16.mxu0 %v778_v0 }
  0x4a   :  { %706 = vmatpush3.bf16.msra.mxu0 %v705_v11 }
  0x4b   :  { %707 = vmatprep.subr.bf16.mxu0 %v778_v0 }
  0x4e   :  { %709 = vmatpush3.bf16.msra.mxu0 %v708_v14 }
  0x4f   :  { %710 = vmatprep.subr.bf16.mxu0 %v778_v0 }
  0x52   :  { %712 = vmatpush3.bf16.msra.mxu0 %v711_v17 }
 0x108   :  { %v169_v5 = vpop.f32.mrb[0].mxu0 }
 0x109   :  { %v170_v6 = vadd.f32 %v427_v4, %v169_v5  ;;  %v535_v7 = vpop.f32.mrb[1].mxu0 }
 0x10b   :  { %743 = vtanh.f32 %v170_v6 }
 0x115   :  { %v744_v8 = vpop.eup %743 }
 0x116   :  { %569 = vmatmul.mubr.f32.vlgmr.msra.gmra.mrb[0].mxu1 %v744_v8 }
 0x117   :  { %638 = vmatprep.mubr.msk.f32.mxu1 %vm779_vm0, %v780_v1  ;;  %v714_v1 = vpack.c.bf16 %v78_v19, %v77_v18 }
 0x119   :  { %715 = vmatpush3.bf16.msra.mxu1 %v714_v1 }
 0x11a   :  { %716 = vmatprep.subr.bf16.mxu1 %v778_v0 }
 0x11d   :  { %718 = vmatpush3.bf16.msra.mxu1 %v717_v22 }
 0x11e   :  { %719 = vmatprep.subr.bf16.mxu1 %v778_v0 }
 0x121   :  { %721 = vmatpush3.bf16.msra.mxu1 %v720_v25 }
 0x122   :  { %722 = vmatprep.subr.bf16.mxu1 %v778_v0 }
 0x125   :  { %724 = vmatpush3.bf16.msra.mxu1 %v723_v28 }
 0x126   :  { %725 = vmatprep.subr.bf16.mxu1 %v778_v0 }
 0x129   :  { %727 = vmatpush3.bf16.msra.mxu1 %v726_v31 }
 0x12a   :  { %728 = vmatprep.subr.bf16.mxu1 %v778_v0 }
 0x12d   :  { %730 = vmatpush3.bf16.msra.mxu1 %v729_v39 }
 0x12e   :  { %731 = vmatprep.subr.bf16.mxu1 %v778_v0 }
 0x131   :  { %733 = vmatpush3.bf16.msra.mxu1 %v732_v42 }
 0x132   :  { %734 = vmatprep.subr.bf16.mxu1 %v778_v0  ;;  %v403_v0 = vld [vmem:[%s863_s1] sm:$0xff] }
 0x135   :  { %736 = vmatpush3.bf16.msra.mxu1 %v735_v45 }
 0x1e9   :  { %v244_v33 = vpop.f32.mrb[0].mxu1 }
 0x1ea   :  { %v245_v34 = vadd.f32 %v428_v32, %v244_v33  ;;  %v570_v35 = vpop.f32.mrb[1].mxu1 }
 0x1ec   :  { %745 = vtanh.f32 %v245_v34 }
 0x1f6   :  { %v746_v36 = vpop.eup %745 }
 0x1f7   :  { %604 = vmatmul.mubr.f32.vlgmr.msra.gmra.mrb[2].mxu0 %v746_v36 }
 0x2ca   :  { %v319_v47 = vpop.f32.mrb[2].mxu0 }
 0x2cb   :  { %v320_v48 = vadd.f32 %v429_v46, %v319_v47  ;;  %v605_v49 = vpop.f32.mrb[3].mxu0 }
 0x2cd   :  { %747 = vtanh.f32 %v320_v48 }
 0x2d7   :  { %v748_v50 = vpop.eup %747 }
 0x2d8   :  { %639 = vmatmul.mubr.f32.vlgmr.msra.gmra.mrb[2].mxu1 %v748_v50 }
 0x3ab   :  { %v394_v52 = vpop.f32.mrb[2].mxu1 }
 0x3ac   :  { %v395_v53 = vadd.f32 %v430_v51, %v394_v52  ;;  %v640_v54 = vpop.f32.mrb[3].mxu1 }
 0x3ae   :  { %749 = vtanh.f32 %v395_v53 }
 0x3b8   :  { %v750_v57 = vpop.eup %749 }
 0x3b9   :  { %v402_v58 = vsel %vm400_vm1, %v750_v57, %v395_v53 }
 0x3ba   :  { %v404_v59 = vsub.f32 %v403_v0, %v402_v58 }
 0x3bc   :  { %v405_v61 = vmul.f32 %v404_v59, %v404_v59 }
 0x3be   :  { %v410_v62 = vmul.f32 %v431_v60, %v405_v61 }
 0x3c0   :  { %411 = vadd.xlane.f32.xlu0 %v410_v62 }
 0x44d   :  { %v412_v2 = vpop.xlane.xlu0 %411 }
 0x44e   :  { %v417_v3 = vadd.f32 %v432_v63, %v412_v2 }
 0x450   :  { %v418_v4 = vmul.f32 -0.5, %v417_v3 }
 0x452   :  { %v420_v5 = vsel %vm419_vm2, %v418_v4, %v402_v58 }
 0x453   :  { %421 = vst [vmem:[%s865_s3] sm:$0xff] %v420_v5 }
 0x454   :  { %426 = vsyncpa [#allocation3], 1 }

</bundles_post_ra>
